<compile_context>
chip_gen: v5e
topology: v5e:2x2
jax: 0.10.0
libtpu: 0.0.40
codegen_flags: <defaults>
</compile_context>

<pallas_src>
import jax
import jax.numpy as jnp
from jax.experimental import pallas as pl
from jax.experimental.pallas import tpu as pltpu


def _make_embed_kernel(ts, seq_len, unroll):
    """Kernel over one tile of `ts` flattened tokens.

    ids_smem : (B*S,) int32 in SMEM (scalar prefetch)
    emb_ref  : (V, D) VMEM-resident embedding table
    pos_ref  : (max_seq, D) VMEM-resident positional table
    out_ref  : (ts, D) output tile
    """

    def kernel(ids_smem, emb_ref, pos_ref, out_ref):
        base = pl.program_id(0) * ts

        def body(t, carry):
            f = base + t                      # flat token index
            tok = ids_smem[f]                 # token id (scalar, SMEM)
            pos = f % seq_len                 # position within its sequence
            row = emb_ref[pl.ds(tok, 1), :] + pos_ref[pl.ds(pos, 1), :]   # (1, D)
            out_ref[pl.ds(t, 1), :] = row
            return carry

        jax.lax.fori_loop(0, ts, body, 0, unroll=unroll)

    return kernel


def _pick_token_tile(n_tokens):
    """Largest tile (multiple of 8 where possible) that divides B*S."""
    for cand in (512, 256, 128, 64, 32, 16, 8):
        if n_tokens % cand == 0:
            return cand
    return n_tokens


def transformer_embedding(ids, emb_table, pos_table):
    """ids: (B, S) int32; emb_table: (V, D); pos_table: (max_seq, D) -> (B, S, D)."""
    B, S = ids.shape
    V, D = emb_table.shape
    max_seq, D2 = pos_table.shape
    assert D == D2, "dimension mismatch between token and positional tables"
    assert S <= max_seq, "sequence longer than positional table"

    n_tokens = B * S
    ts = _pick_token_tile(n_tokens)
    unroll = True if ts <= 64 else 8

    # Clamp ids so an out-of-vocab id can never drive an OOB VMEM read.
    flat_ids = jnp.clip(ids.reshape(-1).astype(jnp.int32), 0, V - 1)

    # ---- VMEM budgeting: tables resident + double-buffered output tile ----
    itemsize = jnp.dtype(emb_table.dtype).itemsize
    need = (V * D + max_seq * D) * itemsize + 2 * ts * D * itemsize
    try:
        vmem_cap = pltpu.get_tpu_info().vmem_capacity_bytes
    except Exception:
        vmem_cap = 64 * 1024 * 1024  # conservative (v7x per-TC)
    assert need + (4 << 20) <= vmem_cap, (
        "embedding table too large for the VMEM-resident fast path; "
        "manual-DMA gather fallback not implemented")
    vmem_limit = int(min(max(need + (4 << 20), 32 << 20), vmem_cap))

    grid_spec = pltpu.PrefetchScalarGridSpec(
        num_scalar_prefetch=1,
        grid=(n_tokens // ts,),
        in_specs=[
            # Full embedding table, DMA'd once and VMEM-resident across the grid.
            pl.BlockSpec((V, D), lambda i, ids_sm: (0, 0)),
            # Full positional table, resident.
            pl.BlockSpec((max_seq, D), lambda i, ids_sm: (0, 0)),
        ],
        # Lane/sublane-dense output tile of ts tokens.
        out_specs=pl.BlockSpec((ts, D), lambda i, ids_sm: (i, 0)),
    )

    out_flat = pl.pallas_call(
        _make_embed_kernel(ts, S, unroll),
        out_shape=jax.ShapeDtypeStruct((n_tokens, D), emb_table.dtype),
        grid_spec=grid_spec,
        compiler_params=pltpu.CompilerParams(
            dimension_semantics=("parallel",),
            vmem_limit_bytes=vmem_limit,
        ),
    )(flat_ids, emb_table, pos_table)

    return out_flat.reshape(B, S, D)


def make_positional_table(max_seq, dim):
    """Sinusoidal positional embeddings.

    The reference module intends pe[:, 0::2] = sin(pos / 1000**(i/dim)),
    pe[:, 1::2] = cos(pos / 1000**(i/dim)).  (The PyTorch source uses `//`,
    which would collapse the denominator to 1; we use the intended float
    exponent form.)
    """
    positions = jnp.arange(max_seq, dtype=jnp.float32)[:, None]      # (max_seq, 1)
    indices = jnp.arange(0, dim, 2, dtype=jnp.float32)[None, :]      # (1, dim//2)
    angle = positions / (1000.0 ** (indices / float(dim)))           # (max_seq, dim//2)
    pe = jnp.zeros((max_seq, dim), dtype=jnp.float32)
    pe = pe.at[:, 0::2].set(jnp.sin(angle))
    pe = pe.at[:, 1::2].set(jnp.cos(angle))
    return pe


if __name__ == "__main__":
    B, S, D = 2, 8, 32
    VOCAB, MAX_SEQ = 50, 16

    key = jax.random.PRNGKey(0)
    k_emb, k_ids = jax.random.split(key)

    # nn.Embedding default init: N(0, 1)
    emb_table = jax.random.normal(k_emb, (VOCAB, D), dtype=jnp.float32)
    pos_table = make_positional_table(MAX_SEQ, D)
    ids = jax.random.randint(k_ids, (B, S), 0, VOCAB, dtype=jnp.int32)

    out = transformer_embedding(ids, emb_table, pos_table)
    out = jax.block_until_ready(out)

    # pure-JAX reference (dropout == identity in eval mode)
    ref = emb_table[ids] + pos_table[:S][None, :, :]
    assert out.shape == (B, S, D)
    assert jnp.allclose(out, ref, atol=1e-6), "mismatch vs reference"

    print("KERNEL_OK")
</pallas_src>

<mosaic_0001>
module attributes {stable_mosaic.version = 11 : i64} {
  func.func @kernel(%arg0: i32, %arg1: memref<16xi32, #tpu.memory_space<smem>>, %arg2: memref<50x32xf32, #tpu.memory_space<vmem>>, %arg3: memref<16x32xf32, #tpu.memory_space<vmem>>, %arg4: memref<16x32xf32, #tpu.memory_space<vmem>>) attributes {dimension_semantics = [#tpu.dimension_semantics<parallel>], iteration_bounds = array<i64: 1>, scalar_prefetch = 1 : i64, scratch_operands = 0 : i64, tpu.core_type = #tpu.core_type<tc>, window_params = [{pipeline_mode = #tpu.pipeline_mode<synchronous>, transform_indices = @transform_0, window_bounds = array<i64: 50, 32>}, {pipeline_mode = #tpu.pipeline_mode<synchronous>, transform_indices = @transform_1, window_bounds = array<i64: 16, 32>}, {transform_indices = @transform_2, window_bounds = array<i64: 16, 32>}]} {
    %c16_i32 = arith.constant 16 : i32
    %0 = arith.muli %arg0, %c16_i32 : i32
    %c0_i32 = arith.constant 0 : i32
    %1 = arith.addi %0, %c0_i32 : i32
    %2 = arith.index_cast %1 : i32 to index
    %3 = memref.load %arg1[%2] : memref<16xi32, #tpu.memory_space<smem>>
    %c8_i32 = arith.constant 8 : i32
    %c0_i32_0 = arith.constant 0 : i32
    %4 = arith.cmpi eq, %c8_i32, %c0_i32_0 : i32
    %c1_i32 = arith.constant 1 : i32
    %5 = arith.select %4, %c1_i32, %c8_i32 : i32
    %6 = arith.remsi %1, %5 : i32
    %c0_i32_1 = arith.constant 0 : i32
    %7 = arith.cmpi ne, %6, %c0_i32_1 : i32
    %c0_i32_2 = arith.constant 0 : i32
    %8 = arith.cmpi slt, %6, %c0_i32_2 : i32
    %c0_i32_3 = arith.constant 0 : i32
    %9 = arith.cmpi slt, %5, %c0_i32_3 : i32
    %10 = arith.xori %8, %9 : i1
    %11 = arith.andi %10, %7 : i1
    %12 = arith.addi %6, %5 : i32
    %13 = arith.select %11, %12, %6 : i32
    %14 = arith.index_cast %3 : i32 to index
    %c0 = arith.constant 0 : index
    %15 = vector.load %arg2[%14, %c0] : memref<50x32xf32, #tpu.memory_space<vmem>>, vector<1x32xf32>
    %16 = arith.index_cast %13 : i32 to index
    %c0_4 = arith.constant 0 : index
    %17 = vector.load %arg3[%16, %c0_4] : memref<16x32xf32, #tpu.memory_space<vmem>>, vector<1x32xf32>
    %18 = arith.addf %15, %17 : vector<1x32xf32>
    %19 = arith.index_cast %c0_i32 : i32 to index
    %c0_5 = arith.constant 0 : index
    %20 = vector.load %arg4[%19, %c0_5] : memref<16x32xf32, #tpu.memory_space<vmem>>, vector<1x32xf32>
    tpu.vector_store %arg4[%19, %c0_5], %18 {strides = array<i32>} : memref<16x32xf32, #tpu.memory_space<vmem>>, vector<1x32xf32>,
    %c1_i32_6 = arith.constant 1 : i32
    %21 = arith.addi %0, %c1_i32_6 : i32
    %22 = arith.index_cast %21 : i32 to index
    %23 = memref.load %arg1[%22] : memref<16xi32, #tpu.memory_space<smem>>
    %c8_i32_7 = arith.constant 8 : i32
    %c0_i32_8 = arith.constant 0 : i32
    %24 = arith.cmpi eq, %c8_i32_7, %c0_i32_8 : i32
    %c1_i32_9 = arith.constant 1 : i32
    %25 = arith.select %24, %c1_i32_9, %c8_i32_7 : i32
    %26 = arith.remsi %21, %25 : i32
    %c0_i32_10 = arith.constant 0 : i32
    %27 = arith.cmpi ne, %26, %c0_i32_10 : i32
    %c0_i32_11 = arith.constant 0 : i32
    %28 = arith.cmpi slt, %26, %c0_i32_11 : i32
    %c0_i32_12 = arith.constant 0 : i32
    %29 = arith.cmpi slt, %25, %c0_i32_12 : i32
    %30 = arith.xori %28, %29 : i1
    %31 = arith.andi %30, %27 : i1
    %32 = arith.addi %26, %25 : i32
    %33 = arith.select %31, %32, %26 : i32
    %34 = arith.index_cast %23 : i32 to index
    %c0_13 = arith.constant 0 : index
    %35 = vector.load %arg2[%34, %c0_13] : memref<50x32xf32, #tpu.memory_space<vmem>>, vector<1x32xf32>
    %36 = arith.index_cast %33 : i32 to index
    %c0_14 = arith.constant 0 : index
    %37 = vector.load %arg3[%36, %c0_14] : memref<16x32xf32, #tpu.memory_space<vmem>>, vector<1x32xf32>
    %38 = arith.addf %35, %37 : vector<1x32xf32>
    %39 = arith.index_cast %c1_i32_6 : i32 to index
    %c0_15 = arith.constant 0 : index
    %40 = vector.load %arg4[%39, %c0_15] : memref<16x32xf32, #tpu.memory_space<vmem>>, vector<1x32xf32>
    tpu.vector_store %arg4[%39, %c0_15], %38 {strides = array<i32>} : memref<16x32xf32, #tpu.memory_space<vmem>>, vector<1x32xf32>,
    %c2_i32 = arith.constant 2 : i32
    %41 = arith.addi %0, %c2_i32 : i32
    %42 = arith.index_cast %41 : i32 to index
    %43 = memref.load %arg1[%42] : memref<16xi32, #tpu.memory_space<smem>>
    %c8_i32_16 = arith.constant 8 : i32
    %c0_i32_17 = arith.constant 0 : i32
    %44 = arith.cmpi eq, %c8_i32_16, %c0_i32_17 : i32
    %c1_i32_18 = arith.constant 1 : i32
    %45 = arith.select %44, %c1_i32_18, %c8_i32_16 : i32
    %46 = arith.remsi %41, %45 : i32
    %c0_i32_19 = arith.constant 0 : i32
    %47 = arith.cmpi ne, %46, %c0_i32_19 : i32
    %c0_i32_20 = arith.constant 0 : i32
    %48 = arith.cmpi slt, %46, %c0_i32_20 : i32
    %c0_i32_21 = arith.constant 0 : i32
    %49 = arith.cmpi slt, %45, %c0_i32_21 : i32
    %50 = arith.xori %48, %49 : i1
    %51 = arith.andi %50, %47 : i1
    %52 = arith.addi %46, %45 : i32
    %53 = arith.select %51, %52, %46 : i32
    %54 = arith.index_cast %43 : i32 to index
    %c0_22 = arith.constant 0 : index
    %55 = vector.load %arg2[%54, %c0_22] : memref<50x32xf32, #tpu.memory_space<vmem>>, vector<1x32xf32>
    %56 = arith.index_cast %53 : i32 to index
    %c0_23 = arith.constant 0 : index
    %57 = vector.load %arg3[%56, %c0_23] : memref<16x32xf32, #tpu.memory_space<vmem>>, vector<1x32xf32>
    %58 = arith.addf %55, %57 : vector<1x32xf32>
    %59 = arith.index_cast %c2_i32 : i32 to index
    %c0_24 = arith.constant 0 : index
    %60 = vector.load %arg4[%59, %c0_24] : memref<16x32xf32, #tpu.memory_space<vmem>>, vector<1x32xf32>
    tpu.vector_store %arg4[%59, %c0_24], %58 {strides = array<i32>} : memref<16x32xf32, #tpu.memory_space<vmem>>, vector<1x32xf32>,
    %c3_i32 = arith.constant 3 : i32
    %61 = arith.addi %0, %c3_i32 : i32
    %62 = arith.index_cast %61 : i32 to index
    %63 = memref.load %arg1[%62] : memref<16xi32, #tpu.memory_space<smem>>
    %c8_i32_25 = arith.constant 8 : i32
    %c0_i32_26 = arith.constant 0 : i32
    %64 = arith.cmpi eq, %c8_i32_25, %c0_i32_26 : i32
    %c1_i32_27 = arith.constant 1 : i32
    %65 = arith.select %64, %c1_i32_27, %c8_i32_25 : i32
    %66 = arith.remsi %61, %65 : i32
    %c0_i32_28 = arith.constant 0 : i32
    %67 = arith.cmpi ne, %66, %c0_i32_28 : i32
    %c0_i32_29 = arith.constant 0 : i32
    %68 = arith.cmpi slt, %66, %c0_i32_29 : i32
    %c0_i32_30 = arith.constant 0 : i32
    %69 = arith.cmpi slt, %65, %c0_i32_30 : i32
    %70 = arith.xori %68, %69 : i1
    %71 = arith.andi %70, %67 : i1
    %72 = arith.addi %66, %65 : i32
    %73 = arith.select %71, %72, %66 : i32
    %74 = arith.index_cast %63 : i32 to index
    %c0_31 = arith.constant 0 : index
    %75 = vector.load %arg2[%74, %c0_31] : memref<50x32xf32, #tpu.memory_space<vmem>>, vector<1x32xf32>
    %76 = arith.index_cast %73 : i32 to index
    %c0_32 = arith.constant 0 : index
    %77 = vector.load %arg3[%76, %c0_32] : memref<16x32xf32, #tpu.memory_space<vmem>>, vector<1x32xf32>
    %78 = arith.addf %75, %77 : vector<1x32xf32>
    %79 = arith.index_cast %c3_i32 : i32 to index
    %c0_33 = arith.constant 0 : index
    %80 = vector.load %arg4[%79, %c0_33] : memref<16x32xf32, #tpu.memory_space<vmem>>, vector<1x32xf32>
    tpu.vector_store %arg4[%79, %c0_33], %78 {strides = array<i32>} : memref<16x32xf32, #tpu.memory_space<vmem>>, vector<1x32xf32>,
    %c4_i32 = arith.constant 4 : i32
    %81 = arith.addi %0, %c4_i32 : i32
    %82 = arith.index_cast %81 : i32 to index
    %83 = memref.load %arg1[%82] : memref<16xi32, #tpu.memory_space<smem>>
    %c8_i32_34 = arith.constant 8 : i32
    %c0_i32_35 = arith.constant 0 : i32
    %84 = arith.cmpi eq, %c8_i32_34, %c0_i32_35 : i32
    %c1_i32_36 = arith.constant 1 : i32
    %85 = arith.select %84, %c1_i32_36, %c8_i32_34 : i32
    %86 = arith.remsi %81, %85 : i32
    %c0_i32_37 = arith.constant 0 : i32
    %87 = arith.cmpi ne, %86, %c0_i32_37 : i32
    %c0_i32_38 = arith.constant 0 : i32
    %88 = arith.cmpi slt, %86, %c0_i32_38 : i32
    %c0_i32_39 = arith.constant 0 : i32
    %89 = arith.cmpi slt, %85, %c0_i32_39 : i32
    %90 = arith.xori %88, %89 : i1
    %91 = arith.andi %90, %87 : i1
    %92 = arith.addi %86, %85 : i32
    %93 = arith.select %91, %92, %86 : i32
    %94 = arith.index_cast %83 : i32 to index
    %c0_40 = arith.constant 0 : index
    %95 = vector.load %arg2[%94, %c0_40] : memref<50x32xf32, #tpu.memory_space<vmem>>, vector<1x32xf32>
    %96 = arith.index_cast %93 : i32 to index
    %c0_41 = arith.constant 0 : index
    %97 = vector.load %arg3[%96, %c0_41] : memref<16x32xf32, #tpu.memory_space<vmem>>, vector<1x32xf32>
    %98 = arith.addf %95, %97 : vector<1x32xf32>
    %99 = arith.index_cast %c4_i32 : i32 to index
    %c0_42 = arith.constant 0 : index
    %100 = vector.load %arg4[%99, %c0_42] : memref<16x32xf32, #tpu.memory_space<vmem>>, vector<1x32xf32>
    tpu.vector_store %arg4[%99, %c0_42], %98 {strides = array<i32>} : memref<16x32xf32, #tpu.memory_space<vmem>>, vector<1x32xf32>,
    %c5_i32 = arith.constant 5 : i32
    %101 = arith.addi %0, %c5_i32 : i32
    %102 = arith.index_cast %101 : i32 to index
    %103 = memref.load %arg1[%102] : memref<16xi32, #tpu.memory_space<smem>>
    %c8_i32_43 = arith.constant 8 : i32
    %c0_i32_44 = arith.constant 0 : i32
    %104 = arith.cmpi eq, %c8_i32_43, %c0_i32_44 : i32
    %c1_i32_45 = arith.constant 1 : i32
    %105 = arith.select %104, %c1_i32_45, %c8_i32_43 : i32
    %106 = arith.remsi %101, %105 : i32
    %c0_i32_46 = arith.constant 0 : i32
    %107 = arith.cmpi ne, %106, %c0_i32_46 : i32
    %c0_i32_47 = arith.constant 0 : i32
    %108 = arith.cmpi slt, %106, %c0_i32_47 : i32
    %c0_i32_48 = arith.constant 0 : i32
    %109 = arith.cmpi slt, %105, %c0_i32_48 : i32
    %110 = arith.xori %108, %109 : i1
    %111 = arith.andi %110, %107 : i1
    %112 = arith.addi %106, %105 : i32
    %113 = arith.select %111, %112, %106 : i32
    %114 = arith.index_cast %103 : i32 to index
    %c0_49 = arith.constant 0 : index
    %115 = vector.load %arg2[%114, %c0_49] : memref<50x32xf32, #tpu.memory_space<vmem>>, vector<1x32xf32>
    %116 = arith.index_cast %113 : i32 to index
    %c0_50 = arith.constant 0 : index
    %117 = vector.load %arg3[%116, %c0_50] : memref<16x32xf32, #tpu.memory_space<vmem>>, vector<1x32xf32>
    %118 = arith.addf %115, %117 : vector<1x32xf32>
    %119 = arith.index_cast %c5_i32 : i32 to index
    %c0_51 = arith.constant 0 : index
    %120 = vector.load %arg4[%119, %c0_51] : memref<16x32xf32, #tpu.memory_space<vmem>>, vector<1x32xf32>
    tpu.vector_store %arg4[%119, %c0_51], %118 {strides = array<i32>} : memref<16x32xf32, #tpu.memory_space<vmem>>, vector<1x32xf32>,
    %c6_i32 = arith.constant 6 : i32
    %121 = arith.addi %0, %c6_i32 : i32
    %122 = arith.index_cast %121 : i32 to index
    %123 = memref.load %arg1[%122] : memref<16xi32, #tpu.memory_space<smem>>
    %c8_i32_52 = arith.constant 8 : i32
    %c0_i32_53 = arith.constant 0 : i32
    %124 = arith.cmpi eq, %c8_i32_52, %c0_i32_53 : i32
    %c1_i32_54 = arith.constant 1 : i32
    %125 = arith.select %124, %c1_i32_54, %c8_i32_52 : i32
    %126 = arith.remsi %121, %125 : i32
    %c0_i32_55 = arith.constant 0 : i32
    %127 = arith.cmpi ne, %126, %c0_i32_55 : i32
    %c0_i32_56 = arith.constant 0 : i32
    %128 = arith.cmpi slt, %126, %c0_i32_56 : i32
    %c0_i32_57 = arith.constant 0 : i32
    %129 = arith.cmpi slt, %125, %c0_i32_57 : i32
    %130 = arith.xori %128, %129 : i1
    %131 = arith.andi %130, %127 : i1
    %132 = arith.addi %126, %125 : i32
    %133 = arith.select %131, %132, %126 : i32
    %134 = arith.index_cast %123 : i32 to index
    %c0_58 = arith.constant 0 : index
    %135 = vector.load %arg2[%134, %c0_58] : memref<50x32xf32, #tpu.memory_space<vmem>>, vector<1x32xf32>
    %136 = arith.index_cast %133 : i32 to index
    %c0_59 = arith.constant 0 : index
    %137 = vector.load %arg3[%136, %c0_59] : memref<16x32xf32, #tpu.memory_space<vmem>>, vector<1x32xf32>
    %138 = arith.addf %135, %137 : vector<1x32xf32>
    %139 = arith.index_cast %c6_i32 : i32 to index
    %c0_60 = arith.constant 0 : index
    %140 = vector.load %arg4[%139, %c0_60] : memref<16x32xf32, #tpu.memory_space<vmem>>, vector<1x32xf32>
    tpu.vector_store %arg4[%139, %c0_60], %138 {strides = array<i32>} : memref<16x32xf32, #tpu.memory_space<vmem>>, vector<1x32xf32>,
    %c7_i32 = arith.constant 7 : i32
    %141 = arith.addi %0, %c7_i32 : i32
    %142 = arith.index_cast %141 : i32 to index
    %143 = memref.load %arg1[%142] : memref<16xi32, #tpu.memory_space<smem>>
    %c8_i32_61 = arith.constant 8 : i32
    %c0_i32_62 = arith.constant 0 : i32
    %144 = arith.cmpi eq, %c8_i32_61, %c0_i32_62 : i32
    %c1_i32_63 = arith.constant 1 : i32
    %145 = arith.select %144, %c1_i32_63, %c8_i32_61 : i32
    %146 = arith.remsi %141, %145 : i32
    %c0_i32_64 = arith.constant 0 : i32
    %147 = arith.cmpi ne, %146, %c0_i32_64 : i32
    %c0_i32_65 = arith.constant 0 : i32
    %148 = arith.cmpi slt, %146, %c0_i32_65 : i32
    %c0_i32_66 = arith.constant 0 : i32
    %149 = arith.cmpi slt, %145, %c0_i32_66 : i32
    %150 = arith.xori %148, %149 : i1
    %151 = arith.andi %150, %147 : i1
    %152 = arith.addi %146, %145 : i32
    %153 = arith.select %151, %152, %146 : i32
    %154 = arith.index_cast %143 : i32 to index
    %c0_67 = arith.constant 0 : index
    %155 = vector.load %arg2[%154, %c0_67] : memref<50x32xf32, #tpu.memory_space<vmem>>, vector<1x32xf32>
    %156 = arith.index_cast %153 : i32 to index
    %c0_68 = arith.constant 0 : index
    %157 = vector.load %arg3[%156, %c0_68] : memref<16x32xf32, #tpu.memory_space<vmem>>, vector<1x32xf32>
    %158 = arith.addf %155, %157 : vector<1x32xf32>
    %159 = arith.index_cast %c7_i32 : i32 to index
    %c0_69 = arith.constant 0 : index
    %160 = vector.load %arg4[%159, %c0_69] : memref<16x32xf32, #tpu.memory_space<vmem>>, vector<1x32xf32>
    tpu.vector_store %arg4[%159, %c0_69], %158 {strides = array<i32>} : memref<16x32xf32, #tpu.memory_space<vmem>>, vector<1x32xf32>,
    %c8_i32_70 = arith.constant 8 : i32
    %161 = arith.addi %0, %c8_i32_70 : i32
    %162 = arith.index_cast %161 : i32 to index
    %163 = memref.load %arg1[%162] : memref<16xi32, #tpu.memory_space<smem>>
    %c8_i32_71 = arith.constant 8 : i32
    %c0_i32_72 = arith.constant 0 : i32
    %164 = arith.cmpi eq, %c8_i32_71, %c0_i32_72 : i32
    %c1_i32_73 = arith.constant 1 : i32
    %165 = arith.select %164, %c1_i32_73, %c8_i32_71 : i32
    %166 = arith.remsi %161, %165 : i32
    %c0_i32_74 = arith.constant 0 : i32
    %167 = arith.cmpi ne, %166, %c0_i32_74 : i32
    %c0_i32_75 = arith.constant 0 : i32
    %168 = arith.cmpi slt, %166, %c0_i32_75 : i32
    %c0_i32_76 = arith.constant 0 : i32
    %169 = arith.cmpi slt, %165, %c0_i32_76 : i32
    %170 = arith.xori %168, %169 : i1
    %171 = arith.andi %170, %167 : i1
    %172 = arith.addi %166, %165 : i32
    %173 = arith.select %171, %172, %166 : i32
    %174 = arith.index_cast %163 : i32 to index
    %c0_77 = arith.constant 0 : index
    %175 = vector.load %arg2[%174, %c0_77] : memref<50x32xf32, #tpu.memory_space<vmem>>, vector<1x32xf32>
    %176 = arith.index_cast %173 : i32 to index
    %c0_78 = arith.constant 0 : index
    %177 = vector.load %arg3[%176, %c0_78] : memref<16x32xf32, #tpu.memory_space<vmem>>, vector<1x32xf32>
    %178 = arith.addf %175, %177 : vector<1x32xf32>
    %179 = arith.index_cast %c8_i32_70 : i32 to index
    %c0_79 = arith.constant 0 : index
    %180 = vector.load %arg4[%179, %c0_79] : memref<16x32xf32, #tpu.memory_space<vmem>>, vector<1x32xf32>
    tpu.vector_store %arg4[%179, %c0_79], %178 {strides = array<i32>} : memref<16x32xf32, #tpu.memory_space<vmem>>, vector<1x32xf32>,
    %c9_i32 = arith.constant 9 : i32
    %181 = arith.addi %0, %c9_i32 : i32
    %182 = arith.index_cast %181 : i32 to index
    %183 = memref.load %arg1[%182] : memref<16xi32, #tpu.memory_space<smem>>
    %c8_i32_80 = arith.constant 8 : i32
    %c0_i32_81 = arith.constant 0 : i32
    %184 = arith.cmpi eq, %c8_i32_80, %c0_i32_81 : i32
    %c1_i32_82 = arith.constant 1 : i32
    %185 = arith.select %184, %c1_i32_82, %c8_i32_80 : i32
    %186 = arith.remsi %181, %185 : i32
    %c0_i32_83 = arith.constant 0 : i32
    %187 = arith.cmpi ne, %186, %c0_i32_83 : i32
    %c0_i32_84 = arith.constant 0 : i32
    %188 = arith.cmpi slt, %186, %c0_i32_84 : i32
    %c0_i32_85 = arith.constant 0 : i32
    %189 = arith.cmpi slt, %185, %c0_i32_85 : i32
    %190 = arith.xori %188, %189 : i1
    %191 = arith.andi %190, %187 : i1
    %192 = arith.addi %186, %185 : i32
    %193 = arith.select %191, %192, %186 : i32
    %194 = arith.index_cast %183 : i32 to index
    %c0_86 = arith.constant 0 : index
    %195 = vector.load %arg2[%194, %c0_86] : memref<50x32xf32, #tpu.memory_space<vmem>>, vector<1x32xf32>
    %196 = arith.index_cast %193 : i32 to index
    %c0_87 = arith.constant 0 : index
    %197 = vector.load %arg3[%196, %c0_87] : memref<16x32xf32, #tpu.memory_space<vmem>>, vector<1x32xf32>
    %198 = arith.addf %195, %197 : vector<1x32xf32>
    %199 = arith.index_cast %c9_i32 : i32 to index
    %c0_88 = arith.constant 0 : index
    %200 = vector.load %arg4[%199, %c0_88] : memref<16x32xf32, #tpu.memory_space<vmem>>, vector<1x32xf32>
    tpu.vector_store %arg4[%199, %c0_88], %198 {strides = array<i32>} : memref<16x32xf32, #tpu.memory_space<vmem>>, vector<1x32xf32>,
    %c10_i32 = arith.constant 10 : i32
    %201 = arith.addi %0, %c10_i32 : i32
    %202 = arith.index_cast %201 : i32 to index
    %203 = memref.load %arg1[%202] : memref<16xi32, #tpu.memory_space<smem>>
    %c8_i32_89 = arith.constant 8 : i32
    %c0_i32_90 = arith.constant 0 : i32
    %204 = arith.cmpi eq, %c8_i32_89, %c0_i32_90 : i32
    %c1_i32_91 = arith.constant 1 : i32
    %205 = arith.select %204, %c1_i32_91, %c8_i32_89 : i32
    %206 = arith.remsi %201, %205 : i32
    %c0_i32_92 = arith.constant 0 : i32
    %207 = arith.cmpi ne, %206, %c0_i32_92 : i32
    %c0_i32_93 = arith.constant 0 : i32
    %208 = arith.cmpi slt, %206, %c0_i32_93 : i32
    %c0_i32_94 = arith.constant 0 : i32
    %209 = arith.cmpi slt, %205, %c0_i32_94 : i32
    %210 = arith.xori %208, %209 : i1
    %211 = arith.andi %210, %207 : i1
    %212 = arith.addi %206, %205 : i32
    %213 = arith.select %211, %212, %206 : i32
    %214 = arith.index_cast %203 : i32 to index
    %c0_95 = arith.constant 0 : index
    %215 = vector.load %arg2[%214, %c0_95] : memref<50x32xf32, #tpu.memory_space<vmem>>, vector<1x32xf32>
    %216 = arith.index_cast %213 : i32 to index
    %c0_96 = arith.constant 0 : index
    %217 = vector.load %arg3[%216, %c0_96] : memref<16x32xf32, #tpu.memory_space<vmem>>, vector<1x32xf32>
    %218 = arith.addf %215, %217 : vector<1x32xf32>
    %219 = arith.index_cast %c10_i32 : i32 to index
    %c0_97 = arith.constant 0 : index
    %220 = vector.load %arg4[%219, %c0_97] : memref<16x32xf32, #tpu.memory_space<vmem>>, vector<1x32xf32>
    tpu.vector_store %arg4[%219, %c0_97], %218 {strides = array<i32>} : memref<16x32xf32, #tpu.memory_space<vmem>>, vector<1x32xf32>,
    %c11_i32 = arith.constant 11 : i32
    %221 = arith.addi %0, %c11_i32 : i32
    %222 = arith.index_cast %221 : i32 to index
    %223 = memref.load %arg1[%222] : memref<16xi32, #tpu.memory_space<smem>>
    %c8_i32_98 = arith.constant 8 : i32
    %c0_i32_99 = arith.constant 0 : i32
    %224 = arith.cmpi eq, %c8_i32_98, %c0_i32_99 : i32
    %c1_i32_100 = arith.constant 1 : i32
    %225 = arith.select %224, %c1_i32_100, %c8_i32_98 : i32
    %226 = arith.remsi %221, %225 : i32
    %c0_i32_101 = arith.constant 0 : i32
    %227 = arith.cmpi ne, %226, %c0_i32_101 : i32
    %c0_i32_102 = arith.constant 0 : i32
    %228 = arith.cmpi slt, %226, %c0_i32_102 : i32
    %c0_i32_103 = arith.constant 0 : i32
    %229 = arith.cmpi slt, %225, %c0_i32_103 : i32
    %230 = arith.xori %228, %229 : i1
    %231 = arith.andi %230, %227 : i1
    %232 = arith.addi %226, %225 : i32
    %233 = arith.select %231, %232, %226 : i32
    %234 = arith.index_cast %223 : i32 to index
    %c0_104 = arith.constant 0 : index
    %235 = vector.load %arg2[%234, %c0_104] : memref<50x32xf32, #tpu.memory_space<vmem>>, vector<1x32xf32>
    %236 = arith.index_cast %233 : i32 to index
    %c0_105 = arith.constant 0 : index
    %237 = vector.load %arg3[%236, %c0_105] : memref<16x32xf32, #tpu.memory_space<vmem>>, vector<1x32xf32>
    %238 = arith.addf %235, %237 : vector<1x32xf32>
    %239 = arith.index_cast %c11_i32 : i32 to index
    %c0_106 = arith.constant 0 : index
    %240 = vector.load %arg4[%239, %c0_106] : memref<16x32xf32, #tpu.memory_space<vmem>>, vector<1x32xf32>
    tpu.vector_store %arg4[%239, %c0_106], %238 {strides = array<i32>} : memref<16x32xf32, #tpu.memory_space<vmem>>, vector<1x32xf32>,
    %c12_i32 = arith.constant 12 : i32
    %241 = arith.addi %0, %c12_i32 : i32
    %242 = arith.index_cast %241 : i32 to index
    %243 = memref.load %arg1[%242] : memref<16xi32, #tpu.memory_space<smem>>
    %c8_i32_107 = arith.constant 8 : i32
    %c0_i32_108 = arith.constant 0 : i32
    %244 = arith.cmpi eq, %c8_i32_107, %c0_i32_108 : i32
    %c1_i32_109 = arith.constant 1 : i32
    %245 = arith.select %244, %c1_i32_109, %c8_i32_107 : i32
    %246 = arith.remsi %241, %245 : i32
    %c0_i32_110 = arith.constant 0 : i32
    %247 = arith.cmpi ne, %246, %c0_i32_110 : i32
    %c0_i32_111 = arith.constant 0 : i32
    %248 = arith.cmpi slt, %246, %c0_i32_111 : i32
    %c0_i32_112 = arith.constant 0 : i32
    %249 = arith.cmpi slt, %245, %c0_i32_112 : i32
    %250 = arith.xori %248, %249 : i1
    %251 = arith.andi %250, %247 : i1
    %252 = arith.addi %246, %245 : i32
    %253 = arith.select %251, %252, %246 : i32
    %254 = arith.index_cast %243 : i32 to index
    %c0_113 = arith.constant 0 : index
    %255 = vector.load %arg2[%254, %c0_113] : memref<50x32xf32, #tpu.memory_space<vmem>>, vector<1x32xf32>
    %256 = arith.index_cast %253 : i32 to index
    %c0_114 = arith.constant 0 : index
    %257 = vector.load %arg3[%256, %c0_114] : memref<16x32xf32, #tpu.memory_space<vmem>>, vector<1x32xf32>
    %258 = arith.addf %255, %257 : vector<1x32xf32>
    %259 = arith.index_cast %c12_i32 : i32 to index
    %c0_115 = arith.constant 0 : index
    %260 = vector.load %arg4[%259, %c0_115] : memref<16x32xf32, #tpu.memory_space<vmem>>, vector<1x32xf32>
    tpu.vector_store %arg4[%259, %c0_115], %258 {strides = array<i32>} : memref<16x32xf32, #tpu.memory_space<vmem>>, vector<1x32xf32>,
    %c13_i32 = arith.constant 13 : i32
    %261 = arith.addi %0, %c13_i32 : i32
    %262 = arith.index_cast %261 : i32 to index
    %263 = memref.load %arg1[%262] : memref<16xi32, #tpu.memory_space<smem>>
    %c8_i32_116 = arith.constant 8 : i32
    %c0_i32_117 = arith.constant 0 : i32
    %264 = arith.cmpi eq, %c8_i32_116, %c0_i32_117 : i32
    %c1_i32_118 = arith.constant 1 : i32
    %265 = arith.select %264, %c1_i32_118, %c8_i32_116 : i32
    %266 = arith.remsi %261, %265 : i32
    %c0_i32_119 = arith.constant 0 : i32
    %267 = arith.cmpi ne, %266, %c0_i32_119 : i32
    %c0_i32_120 = arith.constant 0 : i32
    %268 = arith.cmpi slt, %266, %c0_i32_120 : i32
    %c0_i32_121 = arith.constant 0 : i32
    %269 = arith.cmpi slt, %265, %c0_i32_121 : i32
    %270 = arith.xori %268, %269 : i1
    %271 = arith.andi %270, %267 : i1
    %272 = arith.addi %266, %265 : i32
    %273 = arith.select %271, %272, %266 : i32
    %274 = arith.index_cast %263 : i32 to index
    %c0_122 = arith.constant 0 : index
    %275 = vector.load %arg2[%274, %c0_122] : memref<50x32xf32, #tpu.memory_space<vmem>>, vector<1x32xf32>
    %276 = arith.index_cast %273 : i32 to index
    %c0_123 = arith.constant 0 : index
    %277 = vector.load %arg3[%276, %c0_123] : memref<16x32xf32, #tpu.memory_space<vmem>>, vector<1x32xf32>
    %278 = arith.addf %275, %277 : vector<1x32xf32>
    %279 = arith.index_cast %c13_i32 : i32 to index
    %c0_124 = arith.constant 0 : index
    %280 = vector.load %arg4[%279, %c0_124] : memref<16x32xf32, #tpu.memory_space<vmem>>, vector<1x32xf32>
    tpu.vector_store %arg4[%279, %c0_124], %278 {strides = array<i32>} : memref<16x32xf32, #tpu.memory_space<vmem>>, vector<1x32xf32>,
    %c14_i32 = arith.constant 14 : i32
    %281 = arith.addi %0, %c14_i32 : i32
    %282 = arith.index_cast %281 : i32 to index
    %283 = memref.load %arg1[%282] : memref<16xi32, #tpu.memory_space<smem>>
    %c8_i32_125 = arith.constant 8 : i32
    %c0_i32_126 = arith.constant 0 : i32
    %284 = arith.cmpi eq, %c8_i32_125, %c0_i32_126 : i32
    %c1_i32_127 = arith.constant 1 : i32
    %285 = arith.select %284, %c1_i32_127, %c8_i32_125 : i32
    %286 = arith.remsi %281, %285 : i32
    %c0_i32_128 = arith.constant 0 : i32
    %287 = arith.cmpi ne, %286, %c0_i32_128 : i32
    %c0_i32_129 = arith.constant 0 : i32
    %288 = arith.cmpi slt, %286, %c0_i32_129 : i32
    %c0_i32_130 = arith.constant 0 : i32
    %289 = arith.cmpi slt, %285, %c0_i32_130 : i32
    %290 = arith.xori %288, %289 : i1
    %291 = arith.andi %290, %287 : i1
    %292 = arith.addi %286, %285 : i32
    %293 = arith.select %291, %292, %286 : i32
    %294 = arith.index_cast %283 : i32 to index
    %c0_131 = arith.constant 0 : index
    %295 = vector.load %arg2[%294, %c0_131] : memref<50x32xf32, #tpu.memory_space<vmem>>, vector<1x32xf32>
    %296 = arith.index_cast %293 : i32 to index
    %c0_132 = arith.constant 0 : index
    %297 = vector.load %arg3[%296, %c0_132] : memref<16x32xf32, #tpu.memory_space<vmem>>, vector<1x32xf32>
    %298 = arith.addf %295, %297 : vector<1x32xf32>
    %299 = arith.index_cast %c14_i32 : i32 to index
    %c0_133 = arith.constant 0 : index
    %300 = vector.load %arg4[%299, %c0_133] : memref<16x32xf32, #tpu.memory_space<vmem>>, vector<1x32xf32>
    tpu.vector_store %arg4[%299, %c0_133], %298 {strides = array<i32>} : memref<16x32xf32, #tpu.memory_space<vmem>>, vector<1x32xf32>,
    %c15_i32 = arith.constant 15 : i32
    %301 = arith.addi %0, %c15_i32 : i32
    %302 = arith.index_cast %301 : i32 to index
    %303 = memref.load %arg1[%302] : memref<16xi32, #tpu.memory_space<smem>>
    %c8_i32_134 = arith.constant 8 : i32
    %c0_i32_135 = arith.constant 0 : i32
    %304 = arith.cmpi eq, %c8_i32_134, %c0_i32_135 : i32
    %c1_i32_136 = arith.constant 1 : i32
    %305 = arith.select %304, %c1_i32_136, %c8_i32_134 : i32
    %306 = arith.remsi %301, %305 : i32
    %c0_i32_137 = arith.constant 0 : i32
    %307 = arith.cmpi ne, %306, %c0_i32_137 : i32
    %c0_i32_138 = arith.constant 0 : i32
    %308 = arith.cmpi slt, %306, %c0_i32_138 : i32
    %c0_i32_139 = arith.constant 0 : i32
    %309 = arith.cmpi slt, %305, %c0_i32_139 : i32
    %310 = arith.xori %308, %309 : i1
    %311 = arith.andi %310, %307 : i1
    %312 = arith.addi %306, %305 : i32
    %313 = arith.select %311, %312, %306 : i32
    %314 = arith.index_cast %303 : i32 to index
    %c0_140 = arith.constant 0 : index
    %315 = vector.load %arg2[%314, %c0_140] : memref<50x32xf32, #tpu.memory_space<vmem>>, vector<1x32xf32>
    %316 = arith.index_cast %313 : i32 to index
    %c0_141 = arith.constant 0 : index
    %317 = vector.load %arg3[%316, %c0_141] : memref<16x32xf32, #tpu.memory_space<vmem>>, vector<1x32xf32>
    %318 = arith.addf %315, %317 : vector<1x32xf32>
    %319 = arith.index_cast %c15_i32 : i32 to index
    %c0_142 = arith.constant 0 : index
    %320 = vector.load %arg4[%319, %c0_142] : memref<16x32xf32, #tpu.memory_space<vmem>>, vector<1x32xf32>
    tpu.vector_store %arg4[%319, %c0_142], %318 {strides = array<i32>} : memref<16x32xf32, #tpu.memory_space<vmem>>, vector<1x32xf32>,
    %c16_i32_143 = arith.constant 16 : i32
    return
  }
  func.func @transform_0(%arg0: i32, %arg1: memref<16xi32, #tpu.memory_space<smem>>) -> (i32, i32) {
    %c0_i32 = arith.constant 0 : i32
    %c0_i32_0 = arith.constant 0 : i32
    %c0_i32_1 = arith.constant 0 : i32
    return %c0_i32, %c0_i32_0 : i32, i32
  }
  func.func @transform_1(%arg0: i32, %arg1: memref<16xi32, #tpu.memory_space<smem>>) -> (i32, i32) {
    %c0_i32 = arith.constant 0 : i32
    %c0_i32_0 = arith.constant 0 : i32
    %c0_i32_1 = arith.constant 0 : i32
    return %c0_i32, %c0_i32_0 : i32, i32
  }
  func.func @transform_2(%arg0: i32, %arg1: memref<16xi32, #tpu.memory_space<smem>>) -> (i32, i32) {
    %c0_i32 = arith.constant 0 : i32
    %c0_i32_0 = arith.constant 0 : i32
    return %arg0, %c0_i32 : i32, i32
  }
}

</mosaic_0001>

<bundles_post_ra>
// kernel: tpu_custom_call.1
= control target key start
LH: loop header
LB: loop body
LE: loop exit
PB: predicated region body
PF: predicated region fallthrough
CT: control target
= control target key end

     0   :  { %s465_s15 = smov [#allocation3]   ;;  %s646_s0 = inlined_call_operand.vmem [shape: s32[16], index: 0, kind: input, shape index: {}]   ;;  %s647_s1 = inlined_call_operand.vmem [shape: f32[50,32], index: 1, kind: input, shape index: {}]   ;;  %s648_s2 = inlined_call_operand.vmem [shape: f32[16,32], index: 2, kind: input, shape index: {}]   ;;  %s649_s3 = inlined_call_operand.hbm [shape: f32[16,32], index: 3, kind: output, shape index: {}]  }
   0x1   :  { %s9_s14 = sshll.u32 %s646_s0, 4  ;;  %s10_s14 = int_to_ptr.vmem [resolvable:$true] %s9_s14 }
   0x2   :  { %12 = dma.vmem_to_smem %s10_s14, 16, %s465_s15, [#allocation2] }
   0x3   :  { %461 = dma.done.wait [#allocation2], 16 }
   0x4   :  { %462 = vsyncadd [#allocation2], 4294967280 }
   0x5   :  { %15 = sfence }
   0x6   :  { %s22_s16 = sld [smem:[#allocation3]]  ;;  %v38_v0 = vld [vmem:[%s648_s2] sm:$0x1]  ;;  %vm40_vm0 = vcmask 253952   ;;  %v393_v1 = vld [vmem:[%s648_s2 + $0x1] sm:$0x1] }
   0x7   :  { %s392_s17 = sld [smem:[#allocation3 + $0x1]]  ;;  %v395_v2 = vld [vmem:[%s648_s2 + $0x2] sm:$0x1]  ;;  %v397_v3 = vld [vmem:[%s648_s2 + $0x3] sm:$0x1] }
   0x8   :  { %s394_s18 = sld [smem:[#allocation3 + $0x2]]  ;;  %v399_v5 = vld [vmem:[%s648_s2 + $0x4] sm:$0x1]  ;;  %v401_v8 = vld [vmem:[%s648_s2 + $0x5] sm:$0x1] }
   0x9   :  { %s396_s19 = sld [smem:[#allocation3 + $0x3]]  ;;  %v403_v11 = vld [vmem:[%s648_s2 + $0x6] sm:$0x1]  ;;  %v405_v14 = vld [vmem:[%s648_s2 + $0x7] sm:$0x1] }
   0xa   :  { %s495_s22 = sld [smem:[#allocation3 + $0x4]]  ;;  %v199_v17 = vld [vmem:[%s648_s2] sm:$0x1]  ;;  %v408_v20 = vld [vmem:[%s648_s2 + $0x1] sm:$0x1] }
   0xb   :  { %s500_s0 = sld [smem:[#allocation3 + $0x5]]  ;;  %v410_v23 = vld [vmem:[%s648_s2 + $0x2] sm:$0x1]  ;;  %v412_v26 = vld [vmem:[%s648_s2 + $0x3] sm:$0x1] }
   0xc   :  { %s35_s27 = scalar_lea.vmem %s647_s1, %s22_s16  ;;  %s511_s5 = sld [smem:[#allocation3 + $0x6]]  ;;  %v414_v29 = vld [vmem:[%s648_s2 + $0x4] sm:$0x1]  ;;  %v416_v32 = vld [vmem:[%s648_s2 + $0x5] sm:$0x1] }
   0xd   :  { %v36_v4 = vld [vmem:[%s35_s27] sm:$0x1]  ;;  %s56_s8 = scalar_lea.vmem %s647_s1, %s392_s17  ;;  %s519_s11 = sld [smem:[#allocation3 + $0x7]] }
   0xe   :  { %v39_v6 = vadd.f32 %v38_v0, %v36_v4  ;;  %v57_v7 = vld [vmem:[%s56_s8] sm:$0x1]  ;;  %s76_s14 = scalar_lea.vmem %s647_s1, %s394_s18  ;;  %s527_s20 = sld [smem:[#allocation3 + $0x8]] }
   0xf   :  { %v60_v9 = vadd.f32 %v393_v1, %v57_v7  ;;  %v77_v10 = vld [vmem:[%s76_s14] sm:$0x1]  ;;  %s96_s23 = scalar_lea.vmem %s647_s1, %s396_s19  ;;  %s535_s26 = sld [smem:[#allocation3 + $0x9]] }
  0x10   :  { %41 = vst.msk [vmem:[#allocation4] sm:$0x1] %vm40_vm0, %v39_v6  ;;  %v80_v12 = vadd.f32 %v395_v2, %v77_v10  ;;  %v97_v13 = vld [vmem:[%s96_s23] sm:$0x1]  ;;  %s116_s28 = scalar_lea.vmem %s647_s1, %s495_s22  ;;  %s545_s19 = sld [smem:[#allocation3 + $0xa]] }
  0x11   :  { %61 = vst.msk [vmem:[#allocation4 + $0x1] sm:$0x1] %vm40_vm0, %v60_v9  ;;  %v100_v15 = vadd.f32 %v397_v3, %v97_v13  ;;  %v117_v16 = vld [vmem:[%s116_s28] sm:$0x1]  ;;  %s136_s7 = scalar_lea.vmem %s647_s1, %s500_s0  ;;  %s555_s22 = sld [smem:[#allocation3 + $0xb]] }
  0x12   :  { %81 = vst.msk [vmem:[#allocation4 + $0x2] sm:$0x1] %vm40_vm0, %v80_v12  ;;  %v120_v18 = vadd.f32 %v399_v5, %v117_v16  ;;  %v137_v19 = vld [vmem:[%s136_s7] sm:$0x1]  ;;  %s156_s13 = scalar_lea.vmem %s647_s1, %s511_s5  ;;  %s565_s0 = sld [smem:[#allocation3 + $0xc]] }
  0x13   :  { %101 = vst.msk [vmem:[#allocation4 + $0x3] sm:$0x1] %vm40_vm0, %v100_v15  ;;  %v140_v21 = vadd.f32 %v401_v8, %v137_v19  ;;  %v157_v22 = vld [vmem:[%s156_s13] sm:$0x1]  ;;  %s176_s21 = scalar_lea.vmem %s647_s1, %s519_s11  ;;  %s575_s5 = sld [smem:[#allocation3 + $0xd]] }
  0x14   :  { %121 = vst.msk [vmem:[#allocation4 + $0x4] sm:$0x1] %vm40_vm0, %v120_v18  ;;  %v160_v24 = vadd.f32 %v403_v11, %v157_v22  ;;  %v177_v25 = vld [vmem:[%s176_s21] sm:$0x1]  ;;  %s196_s27 = scalar_lea.vmem %s647_s1, %s527_s20  ;;  %s585_s11 = sld [smem:[#allocation3 + $0xe]] }
  0x15   :  { %141 = vst.msk [vmem:[#allocation4 + $0x5] sm:$0x1] %vm40_vm0, %v140_v21  ;;  %v180_v27 = vadd.f32 %v405_v14, %v177_v25  ;;  %v197_v28 = vld [vmem:[%s196_s27] sm:$0x1]  ;;  %s216_s6 = scalar_lea.vmem %s647_s1, %s535_s26  ;;  %s595_s9 = sld [smem:[#allocation3 + $0xf]] }
  0x16   :  { %161 = vst.msk [vmem:[#allocation4 + $0x6] sm:$0x1] %vm40_vm0, %v160_v24  ;;  %v200_v30 = vadd.f32 %v199_v17, %v197_v28  ;;  %v217_v31 = vld [vmem:[%s216_s6] sm:$0x1]  ;;  %s236_s12 = scalar_lea.vmem %s647_s1, %s545_s19 }
  0x17   :  { %16 = vsyncpa [#allocation5], 0  ;;  %181 = vst.msk [vmem:[#allocation4 + $0x7] sm:$0x1] %vm40_vm0, %v180_v27  ;;  %v220_v33 = vadd.f32 %v408_v20, %v217_v31  ;;  %v237_v34 = vld [vmem:[%s236_s12] sm:$0x1]  ;;  %s256_s16 = scalar_lea.vmem %s647_s1, %s555_s22 }
  0x18   :  { %v418_v35 = vld [vmem:[%s648_s2 + $0x6] sm:$0x1]  ;;  %201 = vst.msk [vmem:[#allocation4 + $0x8] sm:$0x1] %vm40_vm0, %v200_v30  ;;  %v240_v36 = vadd.f32 %v410_v23, %v237_v34  ;;  %v257_v37 = vld [vmem:[%s256_s16] sm:$0x1]  ;;  %s276_s24 = scalar_lea.vmem %s647_s1, %s565_s0 }
  0x19   :  { %s466_s25 = smov [#allocation4]   ;;  %221 = vst.msk [vmem:[#allocation4 + $0x9] sm:$0x1] %vm40_vm0, %v220_v33  ;;  %v260_v38 = vadd.f32 %v412_v26, %v257_v37  ;;  %v277_v39 = vld [vmem:[%s276_s24] sm:$0x1]  ;;  %s296_s28 = scalar_lea.vmem %s647_s1, %s575_s5 }
  0x1a   :  { %s618_s18 = sshll.u32 %s466_s25, 4  ;;  %s348_s4 = sshll.u32 %s649_s3, 4  ;;  %241 = vst.msk [vmem:[#allocation4 + $0xa] sm:$0x1] %vm40_vm0, %v240_v36  ;;  %v280_v40 = vadd.f32 %v414_v29, %v277_v39  ;;  %v297_v41 = vld [vmem:[%s296_s28] sm:$0x1]  ;;  %s347_s18 = int_to_ptr.vmem [resolvable:$true] %s618_s18  ;;  %s349_s4 = int_to_ptr.hbm [resolvable:$true] %s348_s4 }
  0x1b   :  { %s316_s7 = scalar_lea.vmem %s647_s1, %s585_s11  ;;  %v420_v42 = vld [vmem:[%s648_s2 + $0x7] sm:$0x1]  ;;  %261 = vst.msk [vmem:[#allocation4 + $0xb] sm:$0x1] %vm40_vm0, %v260_v38  ;;  %v300_v43 = vadd.f32 %v416_v32, %v297_v41  ;;  %s336_s3 = scalar_lea.vmem %s647_s1, %s595_s9 }
  0x1c   :  { %v317_v44 = vld [vmem:[%s316_s7] sm:$0x1]  ;;  %281 = vst.msk [vmem:[#allocation4 + $0xc] sm:$0x1] %vm40_vm0, %v280_v40  ;;  %s467_s2 = smov 128   ;;  %s468_s11 = smov 8  }
  0x1d   :  { %v320_v45 = vadd.f32 %v418_v35, %v317_v44  ;;  %v337_v46 = vld [vmem:[%s336_s3] sm:$0x1]  ;;  %301 = vst.msk [vmem:[#allocation4 + $0xd] sm:$0x1] %vm40_vm0, %v300_v43 }
  0x1e   :  { %v340_v47 = vadd.f32 %v420_v42, %v337_v46 }
  0x1f   :  { %321 = vst.msk [vmem:[#allocation4 + $0xe] sm:$0x1] %vm40_vm0, %v320_v45 }
  0x20   :  { %341 = vst.msk [vmem:[#allocation4 + $0xf] sm:$0x1] %vm40_vm0, %v340_v47 }
  0x21   :  { %354 = dma.vmem_to_hbm [thread:$0]  %s347_s18, 256, %s349_s4, [#allocation5], %s467_s2, %s467_s2, %s468_s11  }
  0x22   :  { %463 = dma.done.wait [#allocation5], 256  }
  0x23   :  { %464 = vsyncadd [#allocation5], 4294967040 }
  0x24   :  { %359 = vsyncpa [#allocation5], 1 }

</bundles_post_ra>
